<compile_context>
chip_gen: v6e
topology: v6e:2x2x1
jax: 0.10.0
libtpu: 0.0.40
codegen_flags: <defaults>
</compile_context>

<pallas_src>
import functools

import jax
import jax.numpy as jnp
from jax.experimental import pallas as pl
from jax.experimental.pallas import tpu as pltpu

BN_EPS = 1e-5
# PyTorch computes (mask + 1e-45).log() in float32; float32(1e-45) rounds to the
# subnormal 1.4013e-45 whose log is ~-103.2789.  We add this finite constant
# directly (TPU flushes subnormals, so an on-device log(1e-45) would be -inf).
MASKED_LOGIT = -103.27893
# Hard exclusion for the value column / lane-padding columns (never in the softmax).
NEG_PAD = -1e9
LANES = 128
MASK_OFF = 64          # lane offset of the packed additive mask inside the input slab


# ---------------------------------------------------------------------------
# Kernel
# ---------------------------------------------------------------------------
def pandemic_kernel(xm_ref, w_ref, b_ref, out_ref, *, action_dim):
    xm = xm_ref[...]                       # (tb, 128) f32 packed [x | 0 | addmask | 0]
    wdt = w_ref.dtype                      # MXU operand dtype (f32 or bf16)

    # Trunk: 3 x (BN-folded linear -> relu).  Dropout is identity in eval mode.
    h = xm
    for i in range(3):
        h = jnp.maximum(
            jnp.dot(h.astype(wdt), w_ref[i], preferred_element_type=jnp.float32)
            + b_ref[i],
            0.0)

    # Fused policy + value head: cols [0, A) = policy logits, col A = value.
    # b_ref[3] already holds NEG_PAD in cols >= A+1 (padding-lane exclusion).
    head = (jnp.dot(h.astype(wdt), w_ref[3], preferred_element_type=jnp.float32)
            + b_ref[3])

    # Additive mask was packed at lanes [MASK_OFF, MASK_OFF+A] of the input slab;
    # an XLU lane roll aligns it with head lanes [0, A].  Lanes that receive
    # "garbage" after the roll (>= A+1) are dominated by the NEG_PAD bias above.
    addmask = pltpu.roll(xm, shift=MASK_OFF, axis=1)

    # masked_log_softmax over the real action columns.
    logits = head + addmask
    m = jnp.max(logits, axis=-1, keepdims=True)
    z = logits - m
    lse = jnp.log(jnp.sum(jnp.exp(z), axis=-1, keepdims=True))
    logpi = z - lse

    # Value: pull out column `action_dim` with an XLU row-reduce, tanh on (tb, 1).
    col = jax.lax.broadcasted_iota(jnp.int32, head.shape, 1)
    v = jnp.sum(jnp.where(col == action_dim, head, 0.0), axis=-1, keepdims=True)
    tanh_v = jnp.tanh(v)

    # Single lane-dense store: [log pi | tanh(v) | zeros].
    out_ref[...] = jnp.where(col < action_dim, logpi,
                             jnp.where(col == action_dim, tanh_v, 0.0))


# ---------------------------------------------------------------------------
# One-time host-side preprocessing (kept OFF the per-call hot path)
# ---------------------------------------------------------------------------
def fold_and_pack_params(p, *, action_dim, weight_dtype=jnp.float32):
    """Fold eval-mode BN into the linears, fuse heads, pack into two slabs."""
    def fold(w, b, g, be, m, v):
        scale = g * jax.lax.rsqrt(v + BN_EPS)          # (1, H)
        return w * scale, (b - m) * scale + be         # (in, H), (1, H)

    w1, b1 = fold(p["w1"], p["b1"], p["g1"], p["be1"], p["m1"], p["v1"])
    w2, b2 = fold(p["w2"], p["b2"], p["g2"], p["be2"], p["m2"], p["v2"])
    w3, b3 = fold(p["w3"], p["b3"], p["g3"], p["be3"], p["m3"], p["v3"])
    wh = jnp.concatenate([p["wp"], p["wv"]], axis=1)   # (H, A+1)
    bh = jnp.concatenate([p["bp"], p["bv"]], axis=1)   # (1, A+1)

    def pad_w(w):
        return jnp.pad(w, ((0, LANES - w.shape[0]), (0, LANES - w.shape[1])))

    def pad_b(b):
        return jnp.pad(b, ((0, 0), (0, LANES - b.shape[1])))

    # Bake the padding-lane exclusion into the fused head bias (cols >= A+1).
    bh_p = jnp.full((1, LANES), NEG_PAD, jnp.float32).at[:, :action_dim + 1].set(bh)

    w_slab = jnp.stack([pad_w(w1), pad_w(w2), pad_w(w3), pad_w(wh)])   # (4,128,128)
    b_slab = jnp.stack([pad_b(b1), pad_b(b2), pad_b(b3), bh_p])        # (4,1,128)
    return w_slab.astype(weight_dtype), b_slab.astype(jnp.float32)


def pack_inputs(x, mask, *, action_dim):
    """Pack state + precomputed additive mask into ONE lane-dense (B, 128) slab."""
    B, state_dim = x.shape
    assert state_dim <= MASK_OFF, "state_dim must fit below the mask lanes"
    assert MASK_OFF + action_dim + 1 <= LANES, "action_dim+1 must fit in the mask lanes"
    addmask = jnp.where(mask.astype(jnp.float32) > 0.5, 0.0, MASKED_LOGIT)  # (B, A)
    slab = jnp.zeros((B, LANES), jnp.float32)
    slab = slab.at[:, :state_dim].set(x.astype(jnp.float32))
    slab = slab.at[:, MASK_OFF:MASK_OFF + action_dim].set(addmask)
    slab = slab.at[:, MASK_OFF + action_dim].set(NEG_PAD)  # exclude value column
    return slab


def split_outputs(out_slab, action_dim):
    """Slice the packed (B, 128) output slab into (log pi, tanh(v))."""
    return out_slab[:, :action_dim], out_slab[:, action_dim:action_dim + 1]


def _pick_tb(B, cap=1024):
    """Largest multiple-of-8 divisor of B <= cap, preferring >= 2 grid steps (v7x)."""
    mult8 = [t for t in range(min(B, cap), 0, -1) if B % t == 0 and t % 8 == 0]
    for t in mult8:
        if B // t >= 2:
            return t
    return mult8[0] if mult8 else B


# ---------------------------------------------------------------------------
# Forward wrapper
# ---------------------------------------------------------------------------
def pandemic_forward(xm_slab, w_slab, b_slab, *, action_dim, tb=None):
    B, P = xm_slab.shape
    assert P == LANES and action_dim + 1 <= P
    tb = _pick_tb(B) if tb is None else tb
    assert B % tb == 0, "batch tile must divide the batch size"

    out = pl.pallas_call(
        functools.partial(pandemic_kernel, action_dim=action_dim),
        out_shape=jax.ShapeDtypeStruct((B, P), jnp.float32),
        grid=(B // tb,),
        in_specs=[
            pl.BlockSpec((tb, P), lambda i: (i, 0)),
            pl.BlockSpec(w_slab.shape, lambda i: (0, 0, 0)),   # resident weights
            pl.BlockSpec(b_slab.shape, lambda i: (0, 0, 0)),   # resident biases
        ],
        out_specs=pl.BlockSpec((tb, P), lambda i: (i, 0)),
        compiler_params=pltpu.CompilerParams(
            dimension_semantics=("parallel",)),
    )(xm_slab, w_slab, b_slab)

    # Return the packed slab; slice lazily at the point of use (split_outputs).
    return out


# ---------------------------------------------------------------------------
# Pure-JAX reference on the *unfolded* params (eval-mode BN)
# ---------------------------------------------------------------------------
def reference_forward(x, mask, p):
    def layer(h, w, b, g, be, m, v):
        y = h @ w + b
        y = (y - m) * (g * jax.lax.rsqrt(v + BN_EPS)) + be
        return jnp.maximum(y, 0.0)

    h = layer(x, p["w1"], p["b1"], p["g1"], p["be1"], p["m1"], p["v1"])
    h = layer(h, p["w2"], p["b2"], p["g2"], p["be2"], p["m2"], p["v2"])
    h = layer(h, p["w3"], p["b3"], p["g3"], p["be3"], p["m3"], p["v3"])
    pi = h @ p["wp"] + p["bp"]
    v = h @ p["wv"] + p["bv"]
    logits = pi + jnp.where(mask > 0.5, 0.0, MASKED_LOGIT)
    return jax.nn.log_softmax(logits, axis=1), jnp.tanh(v)


def make_params(key, state_dim, hidden, action_dim):
    ks = jax.random.split(key, 24)
    f32 = jnp.float32

    def linear(kw, kb, fan_in, fan_out):
        bound = 1.0 / jnp.sqrt(f32(fan_in))
        w = jax.random.uniform(kw, (fan_in, fan_out), f32, -bound, bound)
        b = jax.random.uniform(kb, (1, fan_out), f32, -bound, bound)
        return w, b

    def bn(kg, kb, km, kv, dim):
        g = 1.0 + 0.1 * jax.random.normal(kg, (1, dim), f32)
        be = 0.1 * jax.random.normal(kb, (1, dim), f32)
        m = 0.1 * jax.random.normal(km, (1, dim), f32)
        v = 0.5 + jnp.abs(jax.random.normal(kv, (1, dim), f32))
        return g, be, m, v

    p = {}
    p["w1"], p["b1"] = linear(ks[0], ks[1], state_dim, hidden)
    p["g1"], p["be1"], p["m1"], p["v1"] = bn(ks[2], ks[3], ks[4], ks[5], hidden)
    p["w2"], p["b2"] = linear(ks[6], ks[7], hidden, hidden)
    p["g2"], p["be2"], p["m2"], p["v2"] = bn(ks[8], ks[9], ks[10], ks[11], hidden)
    p["w3"], p["b3"] = linear(ks[12], ks[13], hidden, hidden)
    p["g3"], p["be3"], p["m3"], p["v3"] = bn(ks[14], ks[15], ks[16], ks[17], hidden)
    p["wp"], p["bp"] = linear(ks[18], ks[19], hidden, action_dim)
    p["wv"], p["bv"] = linear(ks[20], ks[21], hidden, 1)
    return p


if __name__ == "__main__":
    # Small forward-consistent shapes; B=16 -> tb=8 gives a 2-step grid
    # (exercises pipelining and the v7x dual-TensorCore "parallel" path).
    B, STATE_DIM, HIDDEN, ACTION_DIM = 16, 24, 32, 12

    key = jax.random.PRNGKey(0)
    k_x, k_m, k_p = jax.random.split(key, 3)

    x = jax.random.normal(k_x, (B, STATE_DIM), jnp.float32)
    mask = (jax.random.uniform(k_m, (B, ACTION_DIM)) > 0.4).astype(jnp.float32)
    mask = mask.at[:, 0].set(1.0)  # guarantee at least one valid action per row
    params = make_params(k_p, STATE_DIM, HIDDEN, ACTION_DIM)

    # One-time preprocessing (BN fold + head fuse + slab packing + input packing).
    w_f32, b_f32 = fold_and_pack_params(params, action_dim=ACTION_DIM,
                                        weight_dtype=jnp.float32)
    xm = pack_inputs(x, mask, action_dim=ACTION_DIM)

    fwd = jax.jit(pandemic_forward, static_argnames=("action_dim", "tb"))

    # --- f32 path (numerics gate) ---
    out = jax.block_until_ready(fwd(xm, w_f32, b_f32, action_dim=ACTION_DIM))
    logpi, value = split_outputs(out, ACTION_DIM)

    ref_logpi, ref_value = reference_forward(x, mask, params)
    assert logpi.shape == (B, ACTION_DIM) and value.shape == (B, 1)
    assert jnp.allclose(logpi, ref_logpi, atol=1e-4, rtol=1e-4), "policy mismatch"
    assert jnp.allclose(value, ref_value, atol=1e-4, rtol=1e-4), "value mismatch"

    # --- bf16 MXU-operand path (v5e / v7x perf suggestion; looser numerics gate) ---
    w_bf16, b_bf16 = fold_and_pack_params(params, action_dim=ACTION_DIM,
                                          weight_dtype=jnp.bfloat16)
    out_bf = jax.block_until_ready(fwd(xm, w_bf16, b_bf16, action_dim=ACTION_DIM))
    logpi_bf, value_bf = split_outputs(out_bf, ACTION_DIM)
    assert jnp.allclose(logpi_bf, ref_logpi, atol=0.25, rtol=0.05), "bf16 policy mismatch"
    assert jnp.allclose(value_bf, ref_value, atol=0.25, rtol=0.05), "bf16 value mismatch"

    print("KERNEL_OK")
</pallas_src>

<mosaic_0001>
module attributes {stable_mosaic.version = 11 : i64} {
  func.func @pandemic_kernel(%arg0: i32, %arg1: memref<8x128xf32, #tpu.memory_space<vmem>>, %arg2: memref<4x128x128xf32, #tpu.memory_space<vmem>>, %arg3: memref<4x1x128xf32, #tpu.memory_space<vmem>>, %arg4: memref<8x128xf32, #tpu.memory_space<vmem>>) attributes {dimension_semantics = [#tpu.dimension_semantics<parallel>], iteration_bounds = array<i64: 2>, scalar_prefetch = 0 : i64, scratch_operands = 0 : i64, tpu.core_type = #tpu.core_type<tc>, window_params = [{transform_indices = @transform_0, window_bounds = array<i64: 8, 128>}, {pipeline_mode = #tpu.pipeline_mode<synchronous>, transform_indices = @transform_1, window_bounds = array<i64: 4, 128, 128>}, {pipeline_mode = #tpu.pipeline_mode<synchronous>, transform_indices = @transform_2, window_bounds = array<i64: 4, 1, 128>}, {transform_indices = @transform_3, window_bounds = array<i64: 8, 128>}]} {
    %c0 = arith.constant 0 : index
    %c0_0 = arith.constant 0 : index
    %0 = vector.load %arg1[%c0, %c0_0] : memref<8x128xf32, #tpu.memory_space<vmem>>, vector<8x128xf32>
    %c0_1 = arith.constant 0 : index
    %c0_2 = arith.constant 0 : index
    %c0_3 = arith.constant 0 : index
    %1 = vector.load %arg2[%c0_1, %c0_2, %c0_3] : memref<4x128x128xf32, #tpu.memory_space<vmem>>, vector<1x128x128xf32>
    %2 = vector.shape_cast %1 : vector<1x128x128xf32> to vector<128x128xf32>
    %cst = arith.constant dense<0.000000e+00> : vector<8x128xf32>
    %3 = tpu.matmul %0, %2, %cst {dimension_numbers = #tpu.dot_dimension_numbers<[1], [0], [0], [1], [0, 0, 1, 1], [], []>} : vector<8x128xf32>, vector<128x128xf32>, vector<8x128xf32> -> vector<8x128xf32>
    %c0_4 = arith.constant 0 : index
    %c0_5 = arith.constant 0 : index
    %c0_6 = arith.constant 0 : index
    %4 = vector.load %arg3[%c0_4, %c0_5, %c0_6] : memref<4x1x128xf32, #tpu.memory_space<vmem>>, vector<1x1x128xf32>
    %5 = vector.shape_cast %4 : vector<1x1x128xf32> to vector<1x128xf32>
    %6 = vector.broadcast %5 : vector<1x128xf32> to vector<8x128xf32>
    %7 = arith.addf %3, %6 : vector<8x128xf32>
    %cst_7 = arith.constant 0.000000e+00 : f32
    %8 = vector.broadcast %cst_7 : f32 to vector<8x128xf32>
    %9 = arith.maximumf %7, %8 : vector<8x128xf32>
    %c1 = arith.constant 1 : index
    %c0_8 = arith.constant 0 : index
    %c0_9 = arith.constant 0 : index
    %10 = vector.load %arg2[%c1, %c0_8, %c0_9] : memref<4x128x128xf32, #tpu.memory_space<vmem>>, vector<1x128x128xf32>
    %11 = vector.shape_cast %10 : vector<1x128x128xf32> to vector<128x128xf32>
    %cst_10 = arith.constant dense<0.000000e+00> : vector<8x128xf32>
    %12 = tpu.matmul %9, %11, %cst_10 {dimension_numbers = #tpu.dot_dimension_numbers<[1], [0], [0], [1], [0, 0, 1, 1], [], []>} : vector<8x128xf32>, vector<128x128xf32>, vector<8x128xf32> -> vector<8x128xf32>
    %c1_11 = arith.constant 1 : index
    %c0_12 = arith.constant 0 : index
    %c0_13 = arith.constant 0 : index
    %13 = vector.load %arg3[%c1_11, %c0_12, %c0_13] : memref<4x1x128xf32, #tpu.memory_space<vmem>>, vector<1x1x128xf32>
    %14 = vector.shape_cast %13 : vector<1x1x128xf32> to vector<1x128xf32>
    %15 = vector.broadcast %14 : vector<1x128xf32> to vector<8x128xf32>
    %16 = arith.addf %12, %15 : vector<8x128xf32>
    %cst_14 = arith.constant 0.000000e+00 : f32
    %17 = vector.broadcast %cst_14 : f32 to vector<8x128xf32>
    %18 = arith.maximumf %16, %17 : vector<8x128xf32>
    %c2 = arith.constant 2 : index
    %c0_15 = arith.constant 0 : index
    %c0_16 = arith.constant 0 : index
    %19 = vector.load %arg2[%c2, %c0_15, %c0_16] : memref<4x128x128xf32, #tpu.memory_space<vmem>>, vector<1x128x128xf32>
    %20 = vector.shape_cast %19 : vector<1x128x128xf32> to vector<128x128xf32>
    %cst_17 = arith.constant dense<0.000000e+00> : vector<8x128xf32>
    %21 = tpu.matmul %18, %20, %cst_17 {dimension_numbers = #tpu.dot_dimension_numbers<[1], [0], [0], [1], [0, 0, 1, 1], [], []>} : vector<8x128xf32>, vector<128x128xf32>, vector<8x128xf32> -> vector<8x128xf32>
    %c2_18 = arith.constant 2 : index
    %c0_19 = arith.constant 0 : index
    %c0_20 = arith.constant 0 : index
    %22 = vector.load %arg3[%c2_18, %c0_19, %c0_20] : memref<4x1x128xf32, #tpu.memory_space<vmem>>, vector<1x1x128xf32>
    %23 = vector.shape_cast %22 : vector<1x1x128xf32> to vector<1x128xf32>
    %24 = vector.broadcast %23 : vector<1x128xf32> to vector<8x128xf32>
    %25 = arith.addf %21, %24 : vector<8x128xf32>
    %cst_21 = arith.constant 0.000000e+00 : f32
    %26 = vector.broadcast %cst_21 : f32 to vector<8x128xf32>
    %27 = arith.maximumf %25, %26 : vector<8x128xf32>
    %c3 = arith.constant 3 : index
    %c0_22 = arith.constant 0 : index
    %c0_23 = arith.constant 0 : index
    %28 = vector.load %arg2[%c3, %c0_22, %c0_23] : memref<4x128x128xf32, #tpu.memory_space<vmem>>, vector<1x128x128xf32>
    %29 = vector.shape_cast %28 : vector<1x128x128xf32> to vector<128x128xf32>
    %cst_24 = arith.constant dense<0.000000e+00> : vector<8x128xf32>
    %30 = tpu.matmul %27, %29, %cst_24 {dimension_numbers = #tpu.dot_dimension_numbers<[1], [0], [0], [1], [0, 0, 1, 1], [], []>} : vector<8x128xf32>, vector<128x128xf32>, vector<8x128xf32> -> vector<8x128xf32>
    %c3_25 = arith.constant 3 : index
    %c0_26 = arith.constant 0 : index
    %c0_27 = arith.constant 0 : index
    %31 = vector.load %arg3[%c3_25, %c0_26, %c0_27] : memref<4x1x128xf32, #tpu.memory_space<vmem>>, vector<1x1x128xf32>
    %32 = vector.shape_cast %31 : vector<1x1x128xf32> to vector<1x128xf32>
    %33 = vector.broadcast %32 : vector<1x128xf32> to vector<8x128xf32>
    %34 = arith.addf %30, %33 : vector<8x128xf32>
    %c64_i32 = arith.constant 64 : i32
    %35 = tpu.dynamic_rotate %0 by %c64_i32 dim 1 : vector<8x128xf32>, i32 -> vector<8x128xf32>
    %36 = arith.addf %34, %35 : vector<8x128xf32>
    %cst_28 = arith.constant dense<0xFF800000> : vector<8xf32>
    %37 = vector.multi_reduction <maximumf>, %36, %cst_28 [1] : vector<8x128xf32> to vector<8xf32>
    %38 = vector.shape_cast %37 : vector<8xf32> to vector<8x1xf32>
    %39 = vector.broadcast %38 : vector<8x1xf32> to vector<8x128xf32>
    %40 = arith.subf %36, %39 : vector<8x128xf32>
    %41 = math.exp %40 : vector<8x128xf32>
    %cst_29 = arith.constant dense<0.000000e+00> : vector<8xf32>
    %42 = vector.multi_reduction <add>, %41, %cst_29 [1] : vector<8x128xf32> to vector<8xf32>
    %43 = vector.shape_cast %42 : vector<8xf32> to vector<8x1xf32>
    %44 = math.log %43 : vector<8x1xf32>
    %45 = vector.broadcast %44 : vector<8x1xf32> to vector<8x128xf32>
    %46 = arith.subf %40, %45 : vector<8x128xf32>
    %47 = tpu.iota {dimensions = array<i32: 1>} : vector<8x128xi32>
    %c12_i32 = arith.constant 12 : i32
    %48 = vector.broadcast %c12_i32 : i32 to vector<8x128xi32>
    %49 = arith.cmpi eq, %47, %48 : vector<8x128xi32>
    %cst_30 = arith.constant 0.000000e+00 : f32
    %50 = vector.broadcast %cst_30 : f32 to vector<8x128xf32>
    %51 = arith.select %49, %34, %50 : vector<8x128xi1>, vector<8x128xf32>
    %cst_31 = arith.constant dense<0.000000e+00> : vector<8xf32>
    %52 = vector.multi_reduction <add>, %51, %cst_31 [1] : vector<8x128xf32> to vector<8xf32>
    %53 = vector.shape_cast %52 : vector<8xf32> to vector<8x1xf32>
    %54 = math.tanh %53 : vector<8x1xf32>
    %c12_i32_32 = arith.constant 12 : i32
    %55 = vector.broadcast %c12_i32_32 : i32 to vector<8x128xi32>
    %56 = arith.cmpi slt, %47, %55 : vector<8x128xi32>
    %c12_i32_33 = arith.constant 12 : i32
    %57 = vector.broadcast %c12_i32_33 : i32 to vector<8x128xi32>
    %58 = arith.cmpi eq, %47, %57 : vector<8x128xi32>
    %cst_34 = arith.constant 0.000000e+00 : f32
    %59 = vector.shape_cast %54 : vector<8x1xf32> to vector<8x1xf32>
    %60 = vector.broadcast %59 : vector<8x1xf32> to vector<8x128xf32>
    %61 = vector.broadcast %cst_34 : f32 to vector<8x128xf32>
    %62 = arith.select %58, %60, %61 : vector<8x128xi1>, vector<8x128xf32>
    %63 = arith.select %56, %46, %62 : vector<8x128xi1>, vector<8x128xf32>
    %c0_35 = arith.constant 0 : index
    %c0_36 = arith.constant 0 : index
    %64 = vector.load %arg4[%c0_35, %c0_36] : memref<8x128xf32, #tpu.memory_space<vmem>>, vector<8x128xf32>
    tpu.vector_store %arg4[%c0_35, %c0_36], %63 {strides = array<i32>} : memref<8x128xf32, #tpu.memory_space<vmem>>, vector<8x128xf32>,
    return
  }
  func.func @transform_0(%arg0: i32) -> (i32, i32) {
    %c0_i32 = arith.constant 0 : i32
    %c0_i32_0 = arith.constant 0 : i32
    return %arg0, %c0_i32 : i32, i32
  }
  func.func @transform_1(%arg0: i32) -> (i32, i32, i32) {
    %c0_i32 = arith.constant 0 : i32
    %c0_i32_0 = arith.constant 0 : i32
    %c0_i32_1 = arith.constant 0 : i32
    %c0_i32_2 = arith.constant 0 : i32
    return %c0_i32, %c0_i32_0, %c0_i32_1 : i32, i32, i32
  }
  func.func @transform_2(%arg0: i32) -> (i32, i32, i32) {
    %c0_i32 = arith.constant 0 : i32
    %c0_i32_0 = arith.constant 0 : i32
    %c0_i32_1 = arith.constant 0 : i32
    %c0_i32_2 = arith.constant 0 : i32
    return %c0_i32, %c0_i32_0, %c0_i32_1 : i32, i32, i32
  }
  func.func @transform_3(%arg0: i32) -> (i32, i32) {
    %c0_i32 = arith.constant 0 : i32
    %c0_i32_0 = arith.constant 0 : i32
    return %arg0, %c0_i32 : i32, i32
  }
}

</mosaic_0001>

<bundles_post_ra>
// kernel: pandemic_forward.1
= control target key start
LH: loop header
LB: loop body
LE: loop exit
PB: predicated region body
PF: predicated region fallthrough
CT: control target
= control target key end

     0   :  { %8 = vsyncpa [#allocation3], 0  ;;  %s1467_s0 = inlined_call_operand.hbm [shape: f32[16,128], index: 0, kind: input, shape index: {}]   ;;  %s1468_s1 = inlined_call_operand.hbm [shape: f32[4,128,128], index: 1, kind: input, shape index: {}]   ;;  %s1469_s2 = inlined_call_operand.hbm [shape: f32[4,1,128], index: 2, kind: input, shape index: {}]   ;;  %s1470_s3 = inlined_call_operand.hbm [shape: f32[16,128], index: 3, kind: output, shape index: {}]  }
   0x1   :  { %10 = vsyncpa [#allocation3 + $0x1], 0 }
   0x2   :  { %11 = vsyncpa [#allocation6], 0 }
   0x3   :  { %12 = vsyncpa [#allocation4], 0 }
   0x4   :  { %14 = vsyncpa [#allocation4 + $0x1], 0  ;;  %s1213_s12 = smov 0   ;;  %s1215_s13 = smov 0  }
   0x5   :  { %s1217_s14 = smov 0   ;;  %s1219_s15 = smov 0  }
   0x6 LB: > { %s1234_s16 = sadd.s32 4294967295, %s1180_s15   ;;  %s724_s17 = sadd.s32 4294967294, %s1180_s15   ;;  %s1180_s15 = sphi %s1219_s15, %s1492_s15   ;;  %s1176_s14 = sphi %s1217_s14, %s1491_s14   ;;  %s1172_s13 = sphi %s1215_s13, %s1490_s13   ;;  %s1168_s12 = sphi %s1213_s12, %s1489_s12  }
   0x7   : > { %p40_p0 = scmp.ne.s32.totalorder %s1172_s13, %s1168_s12  ;;  %p1471_p1 = scmp.eq.s32.totalorder %s1234_s16, 0 }
   0x8   : > { %p112_p3 = scmp.eq.s32.totalorder %s724_s17, 1  ;;  %p725_p5 = scmp.ge.s32.totalorder %s1180_s15, 1 }
   0x9   : > { %p1243_p4 = por %p1471_p1, %p40_p0  ;;  %p119_p7 = scmp.lt.s32.totalorder %s1180_s15, 3 }
   0xa   : > { %p1248_p6 = por %p112_p3, %p40_p0  ;;  %s1182_s21 = smov [#allocation5]  }
   0xb   : > { %s1475_s18 = scalar_select %p1243_p4, 1, 0 }
   0xc   : > { %s1476_s19 = scalar_select %p1248_p6, 1, 0 }
   0xd   : > { %p1253_p8 = pnand %p725_p5, %p119_p7  ;;  %s131_s22 = sshll.u32 %s1182_s21, 4  ;;  %s132_s22 = int_to_ptr.vmem [resolvable:$true] %s131_s22 }
   0xe   : > { %s1183_s24 = smov [#allocation7]   ;;  %s1043_s26 = scalar_lea.vmem %s132_s22, 8192 }
   0xf   : > { %s1477_s20 = scalar_select %p1253_p8, 1, 0 }
  0x10   : > { %p964_p9 = pneg %p1253_p8  ;;  %s144_s25 = sshll.u32 %s1183_s24, 4  ;;  %s145_s25 = int_to_ptr.vmem [resolvable:$true] %s144_s25 }
  0x11   : > { %p1044_p13 = scmp.ne.s32.totalorder %s132_s22, %s1043_s26  ;;  %p1051_p5 = scmp.lt.s32.totalorder %s132_s22, %s132_s22 }
  0x12   : > { %p1262_p11 = pnand %p964_p9, %p1471_p1  ;;  %p1052_p7 = scmp.lt.s32.totalorder %s1043_s26, %s1043_s26 }
  0x14   : > { %p1034_p12 = pneg %p1262_p11  ;;  %p1053_p10 = por %p1052_p7, %p1051_p5 }
  0x16   : > { %p1046_p0 = pnand %p1044_p13, %p1034_p12 }
  0x18   : > { %p1047_p3 = pneg %p1046_p0 }
  0x1a   : > { %p1054_p9 = pnand %p1053_p10, %p1047_p3 }
  0x1c   : > { %1057 = shalt.err (!%p1054_p9)
}
  0x1d   : > { %s1184_s27 = smov 128   ;;  %s1185_s28 = smov 8  }
  0x1e   : > { %967 = dma.hbm_to_vmem [thread:$0]  (!%p1262_p11), %s1468_s1, 8192, %s132_s22, [#allocation6], %s1184_s27, %s1184_s27, %s1185_s28  }
  0x1f   : > { %s1069_s4 = scalar_lea.vmem %s145_s25, 64  ;;  %p1077_p2 = scmp.lt.s32.totalorder %s145_s25, %s145_s25 }
  0x20   : > { %p1070_p1 = scmp.ne.s32.totalorder %s145_s25, %s1069_s4  ;;  %p1078_p6 = scmp.lt.s32.totalorder %s1069_s4, %s1069_s4 }
  0x22   : > { %p1072_p13 = pnand %p1070_p1, %p1034_p12  ;;  %p1079_p5 = por %p1078_p6, %p1077_p2 }
  0x24   : > { %p1073_p0 = pneg %p1072_p13 }
  0x26   : > { %p1080_p10 = pnand %p1079_p5, %p1073_p0 }
  0x28   : > { %1083 = shalt.err (!%p1080_p10)
}
  0x29   : > { %s1186_s5 = smov 16   ;;  %s1187_s6 = smov 1  }
  0x2a   : > { %970 = dma.hbm_to_vmem [thread:$0]  (!%p1262_p11), %s1469_s2, 64, %s145_s25, [#allocation6], %s1186_s5, %s1186_s5, %s1187_s6  }
  0x2b   : > { %s1285_s9 = sadd.s32 1, %s1180_s15   ;;  %s27_s11 = sadd.s32 1, %s1176_s14 }
  0x2c   : > { %s24_s10 = ssub.s32 %s1180_s15, %s1285_s9  ;;  %p34_p2 = scmp.ne.s32.totalorder %s1176_s14, %s1172_s13 }
  0x2d   : > { %p25_p1 = scmp.eq.s32.totalorder %s24_s10, 0  ;;  %p35_p6 = scmp.eq.s32.totalorder %s1180_s15, 0 }
  0x2e   : > { %p1479_p3 = scmp.eq.s32.totalorder %s1234_s16, 1  ;;  %p981_p9 = scmp.lt.s32.totalorder %s1180_s15, 2 }
  0x2f   : > { %s1294_s17 = scalar_select %p25_p1, %s1176_s14, %s27_s11  }
  0x30   : > { %p36_p12 = por %p35_p6, %p34_p2  ;;  %p1298_p7 = por %p1479_p3, %p34_p2 }
  0x31   : > { %s158_s22 = sand.u32 1, %s1176_s14   ;;  %s730_s24 = sshll.u32 %s1180_s15, 7 }
  0x32   : > { %s1480_s21 = scalar_select %p1298_p7, 1, 0 }
  0x33   : > { %s729_s23 = sshll.u32 %s158_s22, 3  ;;  %s1308_s27 = scalar_lea.hbm %s1467_s0, %s730_s24 }
  0x34   : > { %s162_s28 = scalar_lea.vmem [#allocation2], %s729_s23  ;;  %p1310_p11 = pnand %p981_p9, %p36_p12 }
  0x35   : > { %s169_s29 = sshll.u32 %s162_s28, 4  ;;  %s159_s4 = scalar_lea.sflag [#allocation3], %s158_s22  ;;  %s170_s29 = int_to_ptr.vmem [resolvable:$true] %s169_s29 }
  0x36   : > { %s1084_s5 = scalar_lea.hbm %s1308_s27, 128  ;;  %p1086_p0 = pneg %p1310_p11 }
  0x37   : > { %p1085_p13 = scmp.ne.s32.totalorder %s1308_s27, %s1084_s5  ;;  %s1089_s8 = scalar_lea.hbm %s1467_s0, 256 }
  0x38   : > { %p1090_p1 = scmp.lt.s32.totalorder %s1308_s27, %s1467_s0  ;;  %p1091_p2 = scmp.lt.s32.totalorder %s1089_s8, %s1084_s5 }
  0x39   : > { %p1087_p5 = pnand %p1086_p0, %p1085_p13 }
  0x3a   : > { %p1092_p6 = por %p1091_p2, %p1090_p1 }
  0x3b   : > { %p1088_p10 = pneg %p1087_p5 }
  0x3d   : > { %p1093_p12 = pnand %p1092_p6, %p1088_p10 }
  0x3f   : > { %1096 = shalt.err (!%p1093_p12)
}
  0x40   : > { %s1097_s23 = scalar_lea.vmem %s170_s29, 128  ;;  %s1188_s22 = smov [#allocation2]  }
  0x41   : > { %p1098_p3 = scmp.ne.s32.totalorder %s170_s29, %s1097_s23  ;;  %s1102_s24 = sshll.u32 %s1188_s22, 4  ;;  %s1103_s24 = int_to_ptr.vmem [resolvable:$false] %s1102_s24 }
  0x42   : > { %s1104_s25 = scalar_lea.vmem %s1103_s24, 256  ;;  %p1105_p13 = scmp.lt.s32.totalorder %s170_s29, %s1103_s24 }
  0x43   : > { %p1100_p9 = pnand %p1098_p3, %p1086_p0  ;;  %p1106_p5 = scmp.lt.s32.totalorder %s1104_s25, %s1097_s23 }
  0x45   : > { %p1101_p7 = pneg %p1100_p9  ;;  %p1107_p4 = por %p1106_p5, %p1105_p13 }
  0x47   : > { %p1108_p8 = pnand %p1107_p4, %p1101_p7 }
  0x49   : > { %1111 = shalt.err (!%p1108_p8)
}
  0x4a   : > { %974 = dma.hbm_to_vmem [thread:$0]  (!%p1310_p11), %s1308_s27, 128, %s170_s29, %s159_s4  }
  0x4b   : > { %p1482_p10 = scmp.ne.s32.totalorder %s1477_s20, 0 }
  0x4c   : > { %s1331_s26 = sand.u32 (!%p1482_p10), 1, %s1172_s13   ;;  %p1483_p4 = scmp.ne.s32.totalorder (!%p1482_p10), %s1475_s18, 0 }
  0x4d   : > { %178 = sbr.rel (%p1482_p10) target bundleno = 1235 (0x4d3), region = 32  ;;  %s732_s28 = sshll.u32 (!%p1482_p10), %s1331_s26, 3 }
  0x4e   : > { %s181_s5 = scalar_lea.sflag (!%p1482_p10), [#allocation3], %s1331_s26  ;;  %s1337_s6 = scalar_lea.vmem (!%p1482_p10), [#allocation2], %s732_s28 }
  0x52   : > { %1155 = dma.done.wait (%p1483_p4), %s181_s5, 128  }
  0x53   : > { %1157 = vsyncadd (%p1483_p4), %s181_s5, 4294967168  ;;  %p1484_p8 = scmp.eq.s32.totalorder %s1234_s16, 0 }
  0x55   : > { %1159 = dma.done.wait (%p1484_p8), [#allocation6], 8256   ;;  %p1485_p7 = pmov %p1484_p8 }
  0x56   : > { %v1189_v0 = vmov 0.0   ;;  %vm1190_vm0 = vmmov 0   ;;  %v231_v1 = vld [vmem:[#allocation5 + $0x78] sm:$0xff]  ;;  %v230_v2 = vld [vmem:[#allocation5 + $0x70] sm:$0xff]  ;;  %v229_v3 = vld [vmem:[#allocation5 + $0x68] sm:$0xff]  ;;  %s1191_s18 = smov 64  }
  0x57   : > { %1161 = vsyncadd (%p1485_p7), [#allocation6], 4294959040  ;;  %812 = vmatprep.subr.mxu0 %v1189_v0  ;;  %844 = vmatprep.mubr.msk.f32.mxu0 %vm1190_vm0, %v1189_v0  ;;  %v228_v4 = vld [vmem:[#allocation5 + $0x60] sm:$0xff]  ;;  %v326_v5 = vld [vmem:[#allocation5 + $0xf8] sm:$0xff]  ;;  %s741_s20 = sshll.u32 %s1234_s16, 7  ;;  %s214_s27 = scalar_lea.vmem [#allocation8], %s732_s28 }
  0x58   : > { %847 = vmatprep.subr.mxu1 %v1189_v0  ;;  %879 = vmatprep.mubr.msk.f32.mxu1 %vm1190_vm0, %v1189_v0  ;;  %v227_v6 = vld [vmem:[#allocation5 + $0x58] sm:$0xff]  ;;  %v325_v7 = vld [vmem:[#allocation5 + $0xf0] sm:$0xff]  ;;  %v324_v8 = vld [vmem:[#allocation5 + $0xe8] sm:$0xff]  ;;  %s635_s29 = sshll.u32 %s214_s27, 4  ;;  %s1430_s7 = scalar_lea.hbm %s1470_s3, %s741_s20  ;;  %s636_s29 = int_to_ptr.vmem [resolvable:$true] %s635_s29 }
  0x59   : > { %813 = vmatpush3.msra.mxu0 %v231_v1  ;;  %848 = vmatpush3.msra.mxu1 %v326_v5  ;;  %v226_v9 = vld [vmem:[#allocation5 + $0x50] sm:$0xff]  ;;  %v323_v10 = vld [vmem:[#allocation5 + $0xe0] sm:$0xff]  ;;  %v225_v11 = vld [vmem:[#allocation5 + $0x48] sm:$0xff]  ;;  %s622_s8 = scalar_lea.sflag [#allocation4], %s1331_s26  ;;  %s1112_s10 = scalar_lea.vmem %s636_s29, 128 }
  0x5a   : > { %814 = vmatprep.subr.mxu0 %v1189_v0  ;;  %849 = vmatprep.subr.mxu1 %v1189_v0  ;;  %v322_v12 = vld [vmem:[#allocation5 + $0xd8] sm:$0xff]  ;;  %v224_v13 = vld [vmem:[#allocation5 + $0x40] sm:$0xff]  ;;  %v321_v14 = vld [vmem:[#allocation5 + $0xd0] sm:$0xff]  ;;  %p1113_p11 = scmp.ne.s32.totalorder %s636_s29, %s1112_s10  ;;  %p1486_p0 = scmp.ne.s32.totalorder %s1480_s21, 0 }
  0x5b   : > { %815 = vmatpush3.msra.mxu0 %v230_v2  ;;  %850 = vmatpush3.msra.mxu1 %v325_v7  ;;  %v223_v15 = vld [vmem:[#allocation5 + $0x38] sm:$0xff]  ;;  %v320_v16 = vld [vmem:[#allocation5 + $0xc8] sm:$0xff]  ;;  %v222_v17 = vld [vmem:[#allocation5 + $0x30] sm:$0xff]  ;;  %s1192_s16 = smov [#allocation8]  }
  0x5c   : > { %816 = vmatprep.subr.mxu0 %v1189_v0  ;;  %851 = vmatprep.subr.mxu1 %v1189_v0  ;;  %v319_v18 = vld [vmem:[#allocation5 + $0xc0] sm:$0xff]  ;;  %v221_v19 = vld [vmem:[#allocation5 + $0x28] sm:$0xff]  ;;  %v318_v20 = vld [vmem:[#allocation5 + $0xb8] sm:$0xff]  ;;  %p1114_p1 = pnand %p1113_p11, %p1486_p0  ;;  %s1116_s11 = sshll.u32 %s1192_s16, 4  ;;  %s1117_s11 = int_to_ptr.vmem [resolvable:$false] %s1116_s11 }
  0x5d   : > { %817 = vmatpush3.msra.mxu0 %v229_v3  ;;  %852 = vmatpush3.msra.mxu1 %v324_v8  ;;  %v220_v21 = vld [vmem:[#allocation5 + $0x20] sm:$0xff]  ;;  %v317_v22 = vld [vmem:[#allocation5 + $0xb0] sm:$0xff]  ;;  %v219_v23 = vld [vmem:[#allocation5 + $0x18] sm:$0xff]  ;;  %s1118_s23 = scalar_lea.vmem %s1117_s11, 256  ;;  %p1119_p6 = scmp.lt.s32.totalorder %s636_s29, %s1117_s11 }
  0x5e   : > { %818 = vmatprep.subr.mxu0 %v1189_v0  ;;  %853 = vmatprep.subr.mxu1 %v1189_v0  ;;  %v316_v24 = vld [vmem:[#allocation5 + $0xa8] sm:$0xff]  ;;  %v218_v25 = vld [vmem:[#allocation5 + $0x10] sm:$0xff]  ;;  %v315_v26 = vld [vmem:[#allocation5 + $0xa0] sm:$0xff]  ;;  %p1115_p2 = pneg %p1114_p1  ;;  %p1120_p12 = scmp.lt.s32.totalorder %s1118_s23, %s1112_s10 }
  0x5f   : > { %819 = vmatpush3.msra.mxu0 %v228_v4  ;;  %854 = vmatpush3.msra.mxu1 %v323_v10  ;;  %v217_v27 = vld [vmem:[#allocation5 + $0x8] sm:$0xff]  ;;  %v314_v28 = vld [vmem:[#allocation5 + $0x98] sm:$0xff]  ;;  %v216_v29 = vld [vmem:[#allocation5] sm:$0xff] }
  0x60   : > { %820 = vmatprep.subr.mxu0 %v1189_v0  ;;  %855 = vmatprep.subr.mxu1 %v1189_v0  ;;  %v1379_v30 = vld [vmem:[%s1337_s6] sm:$0xff]  ;;  %v312_v32 = vld [vmem:[#allocation5 + $0x88] sm:$0xff]  ;;  %v311_v33 = vld [vmem:[#allocation5 + $0x80] sm:$0xff]  ;;  %p1121_p3 = por %p1120_p12, %p1119_p6 }
  0x61   : > { %821 = vmatpush3.msra.mxu0 %v227_v6  ;;  %856 = vmatpush3.msra.mxu1 %v322_v12  ;;  %v313_v31 = vld [vmem:[#allocation5 + $0x90] sm:$0xff]  ;;  %v422_v34 = vld [vmem:[#allocation5 + $0x178] sm:$0xff]  ;;  %v420_v36 = vld [vmem:[#allocation5 + $0x168] sm:$0xff] }
  0x62   : > { %822 = vmatprep.subr.mxu0 %v1189_v0  ;;  %857 = vmatprep.subr.mxu1 %v1189_v0  ;;  %v421_v35 = vld [vmem:[#allocation5 + $0x170] sm:$0xff]  ;;  %v419_v37 = vld [vmem:[#allocation5 + $0x160] sm:$0xff]  ;;  %v418_v38 = vld [vmem:[#allocation5 + $0x158] sm:$0xff]  ;;  %p1122_p9 = pnand %p1121_p3, %p1115_p2 }
  0x63   : > { %823 = vmatpush3.msra.mxu0 %v226_v9  ;;  %858 = vmatpush3.msra.mxu1 %v321_v14  ;;  %v417_v39 = vld [vmem:[#allocation5 + $0x150] sm:$0xff]  ;;  %v416_v40 = vld [vmem:[#allocation5 + $0x148] sm:$0xff]  ;;  %v415_v41 = vld [vmem:[#allocation5 + $0x140] sm:$0xff] }
  0x64   : > { %824 = vmatprep.subr.mxu0 %v1189_v0  ;;  %859 = vmatprep.subr.mxu1 %v1189_v0  ;;  %v414_v42 = vld [vmem:[#allocation5 + $0x138] sm:$0xff]  ;;  %v413_v43 = vld [vmem:[#allocation5 + $0x130] sm:$0xff]  ;;  %v412_v44 = vld [vmem:[#allocation5 + $0x128] sm:$0xff] }
  0x65   : > { %825 = vmatpush3.msra.mxu0 %v225_v11  ;;  %860 = vmatpush3.msra.mxu1 %v320_v16  ;;  %v411_v45 = vld [vmem:[#allocation5 + $0x120] sm:$0xff]  ;;  %v410_v46 = vld [vmem:[#allocation5 + $0x118] sm:$0xff]  ;;  %v409_v52 = vld [vmem:[#allocation5 + $0x110] sm:$0xff] }
  0x66   : > { %826 = vmatprep.subr.mxu0 %v1189_v0  ;;  %861 = vmatprep.subr.mxu1 %v1189_v0  ;;  %v736_v47 = vld [vmem:[#allocation7] ss:$0 sm:$0xff]  ;;  %v408_v53 = vld [vmem:[#allocation5 + $0x108] sm:$0xff]  ;;  %v518_v55 = vld [vmem:[#allocation5 + $0x1f8] sm:$0xff] }
  0x67   : > { %827 = vmatpush3.msra.mxu0 %v224_v13  ;;  %862 = vmatpush3.msra.mxu1 %v319_v18  ;;  %v407_v54 = vld [vmem:[#allocation5 + $0x100] sm:$0xff]  ;;  %v517_v56 = vld [vmem:[#allocation5 + $0x1f0] sm:$0xff]  ;;  %v516_v57 = vld [vmem:[#allocation5 + $0x1e8] sm:$0xff] }
  0x68   : > { %828 = vmatprep.subr.mxu0 %v1189_v0  ;;  %863 = vmatprep.subr.mxu1 %v1189_v0  ;;  %v515_v58 = vld [vmem:[#allocation5 + $0x1e0] sm:$0xff]  ;;  %v514_v59 = vld [vmem:[#allocation5 + $0x1d8] sm:$0xff]  ;;  %v513_v60 = vld [vmem:[#allocation5 + $0x1d0] sm:$0xff] }
  0x69   : > { %829 = vmatpush3.msra.mxu0 %v223_v15  ;;  %864 = vmatpush3.msra.mxu1 %v318_v20  ;;  %v512_v61 = vld [vmem:[#allocation5 + $0x1c8] sm:$0xff]  ;;  %v511_v62 = vld [vmem:[#allocation5 + $0x1c0] sm:$0xff]  ;;  %v510_v63 = vld [vmem:[#allocation5 + $0x1b8] sm:$0xff] }
  0x6a   : > { %830 = vmatprep.subr.mxu0 %v1189_v0  ;;  %865 = vmatprep.subr.mxu1 %v1189_v0  ;;  %v509_v1 = vld [vmem:[#allocation5 + $0x1b0] sm:$0xff]  ;;  %v508_v2 = vld [vmem:[#allocation5 + $0x1a8] sm:$0xff]  ;;  %v507_v3 = vld [vmem:[#allocation5 + $0x1a0] sm:$0xff] }
  0x6b   : > { %831 = vmatpush3.msra.mxu0 %v222_v17  ;;  %866 = vmatpush3.msra.mxu1 %v317_v22  ;;  %v506_v4 = vld [vmem:[#allocation5 + $0x198] sm:$0xff]  ;;  %v737_v5 = vld [vmem:[#allocation7 + $0x1] ss:$0 sm:$0xff]  ;;  %v505_v10 = vld [vmem:[#allocation5 + $0x190] sm:$0xff] }
  0x6c   : > { %832 = vmatprep.subr.mxu0 %v1189_v0  ;;  %867 = vmatprep.subr.mxu1 %v1189_v0  ;;  %v504_v11 = vld [vmem:[#allocation5 + $0x188] sm:$0xff]  ;;  %v503_v12 = vld [vmem:[#allocation5 + $0x180] sm:$0xff] }
  0x6d   : > { %833 = vmatpush3.msra.mxu0 %v221_v19  ;;  %868 = vmatpush3.msra.mxu1 %v316_v24  ;;  %v738_v13 = vld [vmem:[#allocation7 + $0x2] ss:$0 sm:$0xff]  ;;  %v739_v18 = vld [vmem:[#allocation7 + $0x3] ss:$0 sm:$0xff] }
  0x6e   : > { %834 = vmatprep.subr.mxu0 %v1189_v0  ;;  %869 = vmatprep.subr.mxu1 %v1189_v0 }
  0x6f   : > { %835 = vmatpush3.msra.mxu0 %v220_v21  ;;  %870 = vmatpush3.msra.mxu1 %v315_v26  ;;  %v610_v26 = vlaneseq }
  0x70   : > { %836 = vmatprep.subr.mxu0 %v1189_v0  ;;  %871 = vmatprep.subr.mxu1 %v1189_v0 }
  0x71   : > { %837 = vmatpush3.msra.mxu0 %v219_v23  ;;  %872 = vmatpush3.msra.mxu1 %v314_v28 }
  0x72   : > { %838 = vmatprep.subr.mxu0 %v1189_v0  ;;  %873 = vmatprep.subr.mxu1 %v1189_v0 }
  0x73   : > { %839 = vmatpush3.msra.mxu0 %v218_v25  ;;  %874 = vmatpush3.msra.mxu1 %v313_v31 }
  0x74   : > { %840 = vmatprep.subr.mxu0 %v1189_v0  ;;  %875 = vmatprep.subr.mxu1 %v1189_v0 }
  0x75   : > { %841 = vmatpush3.msra.mxu0 %v217_v27  ;;  %876 = vmatpush3.msra.mxu1 %v312_v32  ;;  %v611_v27 = vand.u32 127, %v610_v26 }
  0x76   : > { %842 = vmatprep.subr.mxu0 %v1189_v0  ;;  %877 = vmatprep.subr.mxu1 %v1189_v0 }
  0x77   : > { %843 = vmatpush3.msra.mxu0 %v216_v29  ;;  %878 = vmatpush3.msra.mxu1 %v311_v33  ;;  %vm612_vm1 = vcmp.eq.s32.totalorder %v611_v27, 12  ;;  %vm617_vm2 = vcmp.lt.s32.totalorder %v611_v27, 12 }
  0x78   : > { %845 = vmatmul.mubr.f32.vlgmr.msra.gmra.mxu0 %v1379_v30  ;;  %882 = vmatprep.subr.mxu0 %v1189_v0 }
  0x79   : > { %914 = vmatprep.mubr.msk.f32.mxu0 %vm1190_vm0, %v1189_v0  ;;  %917 = vmatprep.subr.mxu1 %v1189_v0 }
  0x7a   : > { %883 = vmatpush3.msra.mxu0 %v422_v34  ;;  %597 = vrot.lane.b32.xlu0 %v1379_v30, %s1191_s18 }
  0x7b   : > { %884 = vmatprep.subr.mxu0 %v1189_v0 }
  0x7c   : > { %885 = vmatpush3.msra.mxu0 %v421_v35 }
  0x7d   : > { %886 = vmatprep.subr.mxu0 %v1189_v0 }
  0x7e   : > { %887 = vmatpush3.msra.mxu0 %v420_v36 }
  0x7f   : > { %888 = vmatprep.subr.mxu0 %v1189_v0 }
  0x80   : > { %889 = vmatpush3.msra.mxu0 %v419_v37 }
  0x81   : > { %890 = vmatprep.subr.mxu0 %v1189_v0 }
  0x82   : > { %891 = vmatpush3.msra.mxu0 %v418_v38 }
  0x83   : > { %892 = vmatprep.subr.mxu0 %v1189_v0 }
  0x84   : > { %893 = vmatpush3.msra.mxu0 %v417_v39 }
  0x85   : > { %894 = vmatprep.subr.mxu0 %v1189_v0 }
  0x86   : > { %895 = vmatpush3.msra.mxu0 %v416_v40 }
  0x87   : > { %896 = vmatprep.subr.mxu0 %v1189_v0 }
  0x88   : > { %897 = vmatpush3.msra.mxu0 %v415_v41 }
  0x89   : > { %898 = vmatprep.subr.mxu0 %v1189_v0 }
  0x8a   : > { %899 = vmatpush3.msra.mxu0 %v414_v42 }
  0x8b   : > { %900 = vmatprep.subr.mxu0 %v1189_v0 }
  0x8c   : > { %901 = vmatpush3.msra.mxu0 %v413_v43 }
  0x8d   : > { %902 = vmatprep.subr.mxu0 %v1189_v0 }
  0x8e   : > { %903 = vmatpush3.msra.mxu0 %v412_v44 }
  0x8f   : > { %904 = vmatprep.subr.mxu0 %v1189_v0 }
  0x90   : > { %905 = vmatpush3.msra.mxu0 %v411_v45 }
  0x91   : > { %906 = vmatprep.subr.mxu0 %v1189_v0 }
  0x92   : > { %907 = vmatpush3.msra.mxu0 %v410_v46 }
  0x93   : > { %908 = vmatprep.subr.mxu0 %v1189_v0 }
  0x94   : > { %909 = vmatpush3.msra.mxu0 %v409_v52 }
  0x95   : > { %910 = vmatprep.subr.mxu0 %v1189_v0 }
  0x96   : > { %911 = vmatpush3.msra.mxu0 %v408_v53 }
  0x97   : > { %912 = vmatprep.subr.mxu0 %v1189_v0 }
  0x98   : > { %913 = vmatpush3.msra.mxu0 %v407_v54 }
  0xec   : > { %v598_v20 = vpop.permute.xlu0 %597 }
 0x138   : > { %v305_v48 = vpop.f32.mrf.mxu0 }
 0x139   : > { %v306_v49 = vadd.f32 %v736_v47, %v305_v48 }
 0x13a   : > { %v846_v50 = vpop.f32.mrf.mxu0 }
 0x13b   : > { %v309_v51 = vmax.f32 %v306_v49, 0.0 }
 0x13d   : > { %880 = vmatmul.mubr.f32.vlgmr.msra.gmra.mxu1 %v309_v51 }
 0x13e   : > { %949 = vmatprep.mubr.msk.f32.mxu1 %vm1190_vm0, %v1189_v0  ;;  %918 = vmatpush3.msra.mxu1 %v518_v55 }
 0x13f   : > { %919 = vmatprep.subr.mxu1 %v1189_v0 }
 0x140   : > { %920 = vmatpush3.msra.mxu1 %v517_v56 }
 0x141   : > { %921 = vmatprep.subr.mxu1 %v1189_v0 }
 0x142   : > { %922 = vmatpush3.msra.mxu1 %v516_v57 }
 0x143   : > { %923 = vmatprep.subr.mxu1 %v1189_v0 }
 0x144   : > { %924 = vmatpush3.msra.mxu1 %v515_v58 }
 0x145   : > { %925 = vmatprep.subr.mxu1 %v1189_v0 }
 0x146   : > { %926 = vmatpush3.msra.mxu1 %v514_v59 }
 0x147   : > { %927 = vmatprep.subr.mxu1 %v1189_v0 }
 0x148   : > { %928 = vmatpush3.msra.mxu1 %v513_v60 }
 0x149   : > { %929 = vmatprep.subr.mxu1 %v1189_v0 }
 0x14a   : > { %930 = vmatpush3.msra.mxu1 %v512_v61 }
 0x14b   : > { %931 = vmatprep.subr.mxu1 %v1189_v0 }
 0x14c   : > { %932 = vmatpush3.msra.mxu1 %v511_v62 }
 0x14d   : > { %933 = vmatprep.subr.mxu1 %v1189_v0 }
 0x14e   : > { %934 = vmatpush3.msra.mxu1 %v510_v63 }
 0x14f   : > { %935 = vmatprep.subr.mxu1 %v1189_v0 }
 0x150   : > { %936 = vmatpush3.msra.mxu1 %v509_v1 }
 0x151   : > { %937 = vmatprep.subr.mxu1 %v1189_v0 }
 0x152   : > { %938 = vmatpush3.msra.mxu1 %v508_v2 }
 0x153   : > { %939 = vmatprep.subr.mxu1 %v1189_v0 }
 0x154   : > { %940 = vmatpush3.msra.mxu1 %v507_v3 }
 0x155   : > { %941 = vmatprep.subr.mxu1 %v1189_v0 }
 0x156   : > { %942 = vmatpush3.msra.mxu1 %v506_v4 }
 0x157   : > { %943 = vmatprep.subr.mxu1 %v1189_v0 }
 0x158   : > { %944 = vmatpush3.msra.mxu1 %v505_v10 }
 0x159   : > { %945 = vmatprep.subr.mxu1 %v1189_v0 }
 0x15a   : > { %946 = vmatpush3.msra.mxu1 %v504_v11 }
 0x15b   : > { %947 = vmatprep.subr.mxu1 %v1189_v0 }
 0x15c   : > { %948 = vmatpush3.msra.mxu1 %v503_v12 }
 0x1fd   : > { %v401_v6 = vpop.f32.mrf.mxu1 }
 0x1fe   : > { %v402_v7 = vadd.f32 %v737_v5, %v401_v6 }
 0x1ff   : > { %v881_v8 = vpop.f32.mrf.mxu1 }
 0x200   : > { %v405_v9 = vmax.f32 %v402_v7, 0.0 }
 0x202   : > { %915 = vmatmul.mubr.f32.vlgmr.msra.gmra.mxu0 %v405_v9 }
 0x2c2   : > { %v497_v14 = vpop.f32.mrf.mxu0 }
 0x2c3   : > { %v498_v15 = vadd.f32 %v738_v13, %v497_v14 }
 0x2c4   : > { %v916_v16 = vpop.f32.mrf.mxu0 }
 0x2c5   : > { %v501_v17 = vmax.f32 %v498_v15, 0.0 }
 0x2c7   : > { %950 = vmatmul.mubr.f32.vlgmr.msra.gmra.mxu1 %v501_v17 }
 0x387   : > { %v593_v19 = vpop.f32.mrf.mxu1 }
 0x388   : > { %v594_v21 = vadd.f32 %v739_v18, %v593_v19 }
 0x389   : > { %v951_v22 = vpop.f32.mrf.mxu1 }
 0x38a   : > { %v599_v23 = vadd.f32 %v598_v20, %v594_v21  ;;  %v613_v29 = vsel %vm612_vm1, %v594_v21, 0.0 }
 0x38c   : > { %600 = vmax.xlane.f32.xlu0 %v599_v23 }
 0x415   : > { %v601_v24 = vpop.xlane.xlu0 %600 }
 0x416   : > { %v602_v0 = vsub.f32 %v599_v23, %v601_v24 }
 0x418   : > { %v603_v25 = vmul.f32 1.442695, %v602_v0 }
 0x41a   : > { %1026 = vpow2.f32 %v603_v25 }
 0x427   : > { %v1027_v28 = vpop.eup %1026 }
 0x428   : > { %605 = vadd.xlane.f32.xlu1 %v1027_v28 }
 0x42c   : > { %614 = vadd.xlane.f32.xlu1 %v613_v29 }
 0x4b1   : > { %v606_v30 = vpop.xlane.xlu1 %605 }
 0x4b2   : > { %1028 = vlog2.f32 %v606_v30 }
 0x4b5   : > { %v615_v31 = vpop.xlane.xlu1 %614 }
 0x4b6   : > { %1030 = vtanh.f32 %v615_v31 }
 0x4bf   : > { %v1029_v32 = vpop.eup %1028 }
 0x4c0   : > { %v608_v33 = vmul.f32 0.6931472, %v1029_v32 }
 0x4c2   : > { %v609_v34 = vsub.f32 %v602_v0, %v608_v33 }
 0x4c3   : > { %v1031_v35 = vpop.eup %1030 }
 0x4c4   : > { %v618_v36 = vsel %vm612_vm1, %v1031_v35, 0.0 }
 0x4c5   : > { %v619_v37 = vsel %vm617_vm2, %v609_v34, %v618_v36 }
 0x4c6   : > { %620 = vst [vmem:[%s214_s27] sm:$0xff] %v619_v37 }
 0x4c7   : > { %1125 = shalt.err (!%p1122_p9)
}
 0x4c8   : > { %s1126_s22 = scalar_lea.hbm %s1430_s7, 128  ;;  %s1130_s26 = scalar_lea.hbm %s1470_s3, 256 }
 0x4c9   : > { %p1127_p13 = scmp.ne.s32.totalorder %s1430_s7, %s1126_s22  ;;  %p1131_p4 = scmp.lt.s32.totalorder %s1430_s7, %s1470_s3 }
 0x4ca   : > { %p1132_p8 = scmp.lt.s32.totalorder %s1130_s26, %s1126_s22 }
 0x4cb   : > { %p1128_p5 = pnand %p1127_p13, %p1486_p0 }
 0x4cc   : > { %p1133_p7 = por %p1132_p8, %p1131_p4 }
 0x4cd   : > { %p1129_p10 = pneg %p1128_p5 }
 0x4cf   : > { %p1134_p11 = pnand %p1133_p7, %p1129_p10 }
 0x4d1   : > { %1137 = shalt.err (!%p1134_p11)
}
 0x4d2   : > { %962 = dma.vmem_to_hbm [thread:$0]  (%p1486_p0), %s636_s29, 128, %s1430_s7, %s622_s8  }
 0x4d3 PF: > { %s647_s6 = sand.u32 1, %s1168_s12   ;;  %p1487_p1 = scmp.ne.s32.totalorder %s1476_s19, 0 }
 0x4d4   : > { %p1488_p2 = scmp.ge.s32.totalorder %s1180_s15, 2  ;;  %s648_s18 = scalar_lea.sflag [#allocation4], %s647_s6 }
 0x4d6   : > { %p976_p6 = pnand %p1488_p2, %p1487_p1 }
 0x4d8   : > { %p977_p12 = pneg %p976_p6 }
 0x4da   : > { %1163 = dma.done.wait (%p977_p12), %s648_s18, 128  }
 0x4db   : > { %1165 = vsyncadd (%p977_p12), %s648_s18, 4294967168  ;;  %p17_p3 = scmp.ge.s32.totalorder %s1285_s9, 4   ;;  %s1489_s12 = smov %s1172_s13 }
 0x4dc   : > { %s1490_s13 = smov %s1176_s14  ;;  %s1491_s14 = smov %s1294_s17 }
 0x4dd   : > { %s1492_s15 = smov %s1285_s9  ;;  %19 = sbr.rel (!%p17_p3) target bundleno = 6 (0x6), region = 91 }
 0x4e2   :  { %653 = vsyncpa [#allocation3], 1 }
 0x4e3   :  { %655 = vsyncpa [#allocation3 + $0x1], 1 }
 0x4e4   :  { %656 = vsyncpa [#allocation6], 1 }
 0x4e5   :  { %657 = vsyncpa [#allocation4], 1 }
 0x4e6   :  { %659 = vsyncpa [#allocation4 + $0x1], 1 }

</bundles_post_ra>
